<compile_context>
chip_gen: v5e
topology: v5e:2x2
jax: 0.10.0
libtpu: 0.0.40
codegen_flags: <defaults>
</compile_context>

<pallas_src>
import functools

import jax
import jax.numpy as jnp
from jax import lax
from jax.experimental import pallas as pl
from jax.experimental.pallas import tpu as pltpu

SMOOTHING = 0.1
LAMBDA_2 = 1e-5


def _loss_tile_kernel(target_ref, logits_ref, mu_ref, std_ref, out_ref, *,
                      batch, tile_batch, n_class):
    """One batch tile: emit (cls partial sum, KL partial sum) into lanes 0/1."""
    i = pl.program_id(0)

    logits = logits_ref[...].astype(jnp.float32)                 # (TB, C)
    tb = logits.shape[0]

    # Validity mask for rows padded past the true batch size.
    row = i * tile_batch + lax.broadcasted_iota(jnp.int32, (tb, 1), 0)
    valid = (row < batch).astype(jnp.float32)                    # (TB, 1)

    # Stable per-row log-sum-exp (2 XLU reductions + EUP exp/log).
    m = jnp.max(logits, axis=-1, keepdims=True)
    lse = m + jnp.log(jnp.sum(jnp.exp(logits - m), axis=-1, keepdims=True))

    # Fused target-gather + row-mean: ONE weighted reduction over classes.
    #   w = s/C everywhere, plus (1-s) on the target column, so
    #   sum(w * logits) == (1-s)*tgt_logit + s*mean(logits).
    tgt = target_ref[...]                                        # (TB, 1) int32
    col = lax.broadcasted_iota(jnp.int32, (tb, n_class), 1)
    base_w = SMOOTHING / n_class
    w = jnp.where(col == tgt, base_w + (1.0 - SMOOTHING), base_w)
    wsum = jnp.sum(w * logits, axis=-1, keepdims=True)           # (TB, 1)

    # per_example = lse - (1-s)*tgt_logit - s*mean(logits)
    per_example = lse - wsum
    cls_partial = jnp.sum(per_example * valid)                   # scalar

    # KL partial: 0.5*sum(mu^2 + std^2) - sum(log std) over valid rows.
    # (the "-0.5 * B * D" constant is applied once, outside the kernel)
    mu = mu_ref[...].astype(jnp.float32)
    std = std_ref[...].astype(jnp.float32)
    kl_partial = (0.5 * jnp.sum((mu * mu + std * std) * valid)
                  - jnp.sum(jnp.log(std) * valid))               # scalar

    # Lane-dense (1, 8, 128) partials block: lane 0 = cls, lane 1 = KL.
    lane = lax.broadcasted_iota(jnp.int32, (1, 8, 128), 2)
    out_ref[...] = jnp.where(lane == 0, cls_partial,
                             jnp.where(lane == 1, kl_partial, 0.0))


def _vmem_capacity_bytes():
    """Physical VMEM of the attached chip (fallback: assume 128 MiB v5e/v6e)."""
    try:
        return int(pltpu.get_tpu_info().vmem_capacity_bytes)
    except Exception:
        return 128 * 1024 * 1024


def _per_row_live_bytes(n_class, latent, logits_isz, dist_isz, logits_buffers):
    """Live in-kernel VMEM bytes per batch row (inputs + f32 intermediates)."""
    return (logits_buffers * n_class * logits_isz   # pipelined logits buffers
            + 5 * n_class * 4                       # f32 cast + iota/weights/prod/exp temps
            + 2 * 2 * latent * dist_isz             # mu/std, double-buffered
            + 3 * 2 * latent * 4                    # f32 casts / KL temps
            + 2 * 128 * 4)                          # lane-padded (TB,1)->(TB,128) target, x2


def _choose_tile_batch(batch, n_class, latent, logits_isz, dist_isz,
                       budget_bytes):
    """Largest batch tile whose live in-kernel set fits ``budget_bytes``."""
    per_row = _per_row_live_bytes(n_class, latent, logits_isz, dist_isz,
                                  logits_buffers=2)
    tb = budget_bytes // max(per_row, 1)
    tb = int(max(8, min(8192, tb)))          # cap raised so tiles reach ~1-2 MiB
    tb = (tb // 8) * 8
    b_pad8 = ((batch + 7) // 8) * 8
    return max(8, min(tb, b_pad8))


def loss_forward(logits, target, z, z_prior, mu, std, tile_batch=None):
    """Matches Loss(n_class).forward(logits, target, z, z_prior, mu, std)."""
    del z, z_prior  # unused in the PyTorch forward
    batch, n_class = logits.shape
    latent = mu.shape[1]
    logits_isz = jnp.dtype(logits.dtype).itemsize
    dist_isz = max(jnp.dtype(mu.dtype).itemsize, jnp.dtype(std.dtype).itemsize)

    # Generation-aware VMEM: ~48 MiB limit on v7x (64 MiB phys), 96 MiB on
    # v5e/v6e (128 MiB phys); tile live-set budget is half the scoped limit.
    vmem_cap = _vmem_capacity_bytes()
    vmem_limit = int(min(int(vmem_cap * 3 // 4), 96 * 1024 * 1024))
    budget = vmem_limit // 2

    if tile_batch is None:
        tile_batch = _choose_tile_batch(batch, n_class, latent,
                                        logits_isz, dist_isz, budget)
    else:
        # Validate user-supplied tile: multiple of 8 ((8,128) constraint).
        tile_batch = max(8, (int(tile_batch) // 8) * 8)

    n_tiles = -(-batch // tile_batch)
    b_pad = n_tiles * tile_batch
    pad = b_pad - batch

    target2d = target.astype(jnp.int32).reshape(-1, 1)
    if pad:
        logits = jnp.pad(logits, ((0, pad), (0, 0)))
        target2d = jnp.pad(target2d, ((0, pad), (0, 0)))
        mu = jnp.pad(mu, ((0, pad), (0, 0)))
        std = jnp.pad(std, ((0, pad), (0, 0)), constant_values=1.0)

    # Deepen the dominant (logits) stream to 3 buffers when the grid is long
    # enough for it to matter and the extra buffer still fits the budget.
    # TODO(synk): for vocab-scale n_class (>=16K) add a second "arbitrary"
    # grid axis over classes with online-LSE accumulation in VMEM scratch.
    live3 = tile_batch * _per_row_live_bytes(n_class, latent, logits_isz,
                                             dist_isz, logits_buffers=3)
    logits_spec = pl.BlockSpec((tile_batch, n_class), lambda i: (i, 0))
    if n_tiles > 2 and live3 <= budget:
        try:
            logits_spec = pl.BlockSpec((tile_batch, n_class), lambda i: (i, 0),
                                       pipeline_mode=pl.Buffered(3))
        except (TypeError, AttributeError):
            pass  # older API: keep the default double buffer

    kernel = functools.partial(_loss_tile_kernel, batch=batch,
                               tile_batch=tile_batch, n_class=n_class)

    partials = pl.pallas_call(
        kernel,
        out_shape=jax.ShapeDtypeStruct((n_tiles, 8, 128), jnp.float32),
        grid=(n_tiles,),
        in_specs=[
            pl.BlockSpec((tile_batch, 1), lambda i: (i, 0)),
            logits_spec,
            pl.BlockSpec((tile_batch, latent), lambda i: (i, 0)),
            pl.BlockSpec((tile_batch, latent), lambda i: (i, 0)),
        ],
        out_specs=pl.BlockSpec((1, 8, 128), lambda i: (i, 0, 0)),
        compiler_params=pltpu.CompilerParams(
            dimension_semantics=("parallel",),
            vmem_limit_bytes=vmem_limit,
        ),
    )(target2d, logits, mu, std)

    # Tiny final reduction in plain JAX (keeps the grid axis parallel).
    cls_loss = jnp.sum(partials[:, 0, 0]) / batch
    kl = jnp.sum(partials[:, 0, 1]) - 0.5 * batch * latent
    return LAMBDA_2 * kl + cls_loss


def _loss_reference(logits, target, mu, std):
    logprobs = jax.nn.log_softmax(logits.astype(jnp.float32), axis=-1)
    nll = -jnp.take_along_axis(logprobs, target[:, None], axis=-1)[:, 0]
    smooth = -jnp.mean(logprobs, axis=-1)
    cls = jnp.mean((1.0 - SMOOTHING) * nll + SMOOTHING * smooth)
    kl = 0.5 * jnp.sum(mu.astype(jnp.float32) ** 2 + std.astype(jnp.float32) ** 2
                       - 2.0 * jnp.log(std.astype(jnp.float32)) - 1.0)
    return LAMBDA_2 * kl + cls


if __name__ == "__main__":
    key = jax.random.PRNGKey(0)
    k1, k2, k3, k4, k5 = jax.random.split(key, 5)

    # 1) Small shapes consistent with the module's forward.
    B, n_class, latent = 8, 32, 32
    logits = jax.random.normal(k1, (B, n_class), dtype=jnp.float32)
    target = jax.random.randint(k2, (B,), 0, n_class, dtype=jnp.int32)
    mu = jax.random.normal(k3, (B, latent), dtype=jnp.float32)
    std = jax.nn.softplus(jax.random.normal(k4, (B, latent), dtype=jnp.float32)) + 0.1
    z = jax.random.normal(k5, (B, latent), dtype=jnp.float32)       # unused
    z_prior = jnp.zeros((B, latent), dtype=jnp.float32)             # unused

    out = loss_forward(logits, target, z, z_prior, mu, std)
    jax.block_until_ready(out)
    ref = _loss_reference(logits, target, mu, std)
    assert jnp.allclose(out, ref, rtol=1e-5, atol=1e-5), (out, ref)

    # 2) Multi-tile / padded-batch path (exercises the 3-deep logits pipeline).
    kb = jax.random.split(jax.random.PRNGKey(1), 4)
    B2, C2, D2 = 132, 160, 64
    logits2 = jax.random.normal(kb[0], (B2, C2), dtype=jnp.float32)
    target2 = jax.random.randint(kb[1], (B2,), 0, C2, dtype=jnp.int32)
    mu2 = jax.random.normal(kb[2], (B2, D2), dtype=jnp.float32)
    std2 = jax.nn.softplus(jax.random.normal(kb[3], (B2, D2), dtype=jnp.float32)) + 0.1
    out2 = loss_forward(logits2, target2, mu2, mu2, mu2, std2, tile_batch=64)
    jax.block_until_ready(out2)
    ref2 = _loss_reference(logits2, target2, mu2, std2)
    assert jnp.allclose(out2, ref2, rtol=1e-5, atol=1e-5), (out2, ref2)

    # 3) Non-multiple-of-8 user tile_batch gets validated (rounds 60 -> 56).
    out3 = loss_forward(logits2, target2, mu2, mu2, mu2, std2, tile_batch=60)
    jax.block_until_ready(out3)
    assert jnp.allclose(out3, ref2, rtol=1e-5, atol=1e-5), (out3, ref2)

    # 4) bf16 inputs: cast to f32 happens inside the kernel.
    kc = jax.random.split(jax.random.PRNGKey(2), 4)
    B4, C4, D4 = 64, 96, 32
    logits4 = jax.random.normal(kc[0], (B4, C4), dtype=jnp.float32).astype(jnp.bfloat16)
    target4 = jax.random.randint(kc[1], (B4,), 0, C4, dtype=jnp.int32)
    mu4 = jax.random.normal(kc[2], (B4, D4), dtype=jnp.float32).astype(jnp.bfloat16)
    std4 = (jax.nn.softplus(jax.random.normal(kc[3], (B4, D4), dtype=jnp.float32))
            + 0.1).astype(jnp.bfloat16)
    out4 = loss_forward(logits4, target4, mu4, mu4, mu4, std4)
    jax.block_until_ready(out4)
    ref4 = _loss_reference(logits4, target4, mu4, std4)
    assert jnp.allclose(out4, ref4, rtol=1e-3, atol=1e-3), (out4, ref4)

    print("KERNEL_OK")
</pallas_src>

<mosaic_0001>
module attributes {stable_mosaic.version = 11 : i64} {
  func.func @_loss_tile_kernel(%arg0: i32, %arg1: memref<8x1xi32, #tpu.memory_space<vmem>>, %arg2: memref<8x32xf32, #tpu.memory_space<vmem>>, %arg3: memref<8x32xf32, #tpu.memory_space<vmem>>, %arg4: memref<8x32xf32, #tpu.memory_space<vmem>>, %arg5: memref<1x8x128xf32, #tpu.memory_space<vmem>>) attributes {dimension_semantics = [#tpu.dimension_semantics<parallel>], iteration_bounds = array<i64: 1>, scalar_prefetch = 0 : i64, scratch_operands = 0 : i64, tpu.core_type = #tpu.core_type<tc>, window_params = [{transform_indices = @transform_0, window_bounds = array<i64: 8, 1>}, {transform_indices = @transform_1, window_bounds = array<i64: 8, 32>}, {transform_indices = @transform_2, window_bounds = array<i64: 8, 32>}, {transform_indices = @transform_3, window_bounds = array<i64: 8, 32>}, {transform_indices = @transform_4, window_bounds = array<i64: 1, 8, 128>}]} {
    %c0 = arith.constant 0 : index
    %c0_0 = arith.constant 0 : index
    %0 = vector.load %arg2[%c0, %c0_0] : memref<8x32xf32, #tpu.memory_space<vmem>>, vector<8x32xf32>
    %c8_i32 = arith.constant 8 : i32
    %1 = arith.muli %arg0, %c8_i32 : i32
    %2 = tpu.iota {dimensions = array<i32: 0>} : vector<8x1xi32>
    %3 = vector.broadcast %1 : i32 to vector<8x1xi32>
    %4 = arith.addi %3, %2 : vector<8x1xi32>
    %c8_i32_1 = arith.constant 8 : i32
    %5 = vector.broadcast %c8_i32_1 : i32 to vector<8x1xi32>
    %6 = arith.cmpi slt, %4, %5 : vector<8x1xi32>
    %7 = arith.extui %6 : vector<8x1xi1> to vector<8x1xi32>
    %8 = arith.sitofp %7 : vector<8x1xi32> to vector<8x1xf32>
    %cst = arith.constant dense<0xFF800000> : vector<8xf32>
    %9 = vector.multi_reduction <maximumf>, %0, %cst [1] : vector<8x32xf32> to vector<8xf32>
    %10 = vector.shape_cast %9 : vector<8xf32> to vector<8x1xf32>
    %11 = vector.broadcast %10 : vector<8x1xf32> to vector<8x32xf32>
    %12 = arith.subf %0, %11 : vector<8x32xf32>
    %13 = math.exp %12 : vector<8x32xf32>
    %cst_2 = arith.constant dense<0.000000e+00> : vector<8xf32>
    %14 = vector.multi_reduction <add>, %13, %cst_2 [1] : vector<8x32xf32> to vector<8xf32>
    %15 = vector.shape_cast %14 : vector<8xf32> to vector<8x1xf32>
    %16 = math.log %15 : vector<8x1xf32>
    %17 = arith.addf %10, %16 : vector<8x1xf32>
    %c0_3 = arith.constant 0 : index
    %c0_4 = arith.constant 0 : index
    %18 = vector.load %arg1[%c0_3, %c0_4] : memref<8x1xi32, #tpu.memory_space<vmem>>, vector<8x1xi32>
    %19 = tpu.iota {dimensions = array<i32: 1>} : vector<8x32xi32>
    %20 = vector.broadcast %18 : vector<8x1xi32> to vector<8x32xi32>
    %21 = arith.cmpi eq, %19, %20 : vector<8x32xi32>
    %cst_5 = arith.constant 0.903124988 : f32
    %cst_6 = arith.constant 3.125000e-03 : f32
    %22 = vector.broadcast %cst_5 : f32 to vector<8x32xf32>
    %23 = vector.broadcast %cst_6 : f32 to vector<8x32xf32>
    %24 = arith.select %21, %22, %23 : vector<8x32xi1>, vector<8x32xf32>
    %25 = arith.mulf %24, %0 : vector<8x32xf32>
    %cst_7 = arith.constant dense<0.000000e+00> : vector<8xf32>
    %26 = vector.multi_reduction <add>, %25, %cst_7 [1] : vector<8x32xf32> to vector<8xf32>
    %27 = vector.shape_cast %26 : vector<8xf32> to vector<8x1xf32>
    %28 = arith.subf %17, %27 : vector<8x1xf32>
    %29 = arith.mulf %28, %8 : vector<8x1xf32>
    %30 = vector.shape_cast %29 : vector<8x1xf32> to vector<1x8x1xf32>
    %cst_8 = arith.constant dense<0.000000e+00> : vector<1xf32>
    %31 = vector.multi_reduction <add>, %30, %cst_8 [1, 2] : vector<1x8x1xf32> to vector<1xf32>
    %32 = vector.shape_cast %31 : vector<1xf32> to vector<1x1x1xf32>
    %33 = vector.extract %32[0, 0, 0] : f32 from vector<1x1x1xf32>
    %c0_9 = arith.constant 0 : index
    %c0_10 = arith.constant 0 : index
    %34 = vector.load %arg3[%c0_9, %c0_10] : memref<8x32xf32, #tpu.memory_space<vmem>>, vector<8x32xf32>
    %c0_11 = arith.constant 0 : index
    %c0_12 = arith.constant 0 : index
    %35 = vector.load %arg4[%c0_11, %c0_12] : memref<8x32xf32, #tpu.memory_space<vmem>>, vector<8x32xf32>
    %36 = arith.mulf %34, %34 : vector<8x32xf32>
    %37 = arith.mulf %35, %35 : vector<8x32xf32>
    %38 = arith.addf %36, %37 : vector<8x32xf32>
    %39 = vector.broadcast %8 : vector<8x1xf32> to vector<8x32xf32>
    %40 = arith.mulf %38, %39 : vector<8x32xf32>
    %41 = vector.shape_cast %40 : vector<8x32xf32> to vector<1x8x32xf32>
    %cst_13 = arith.constant dense<0.000000e+00> : vector<1xf32>
    %42 = vector.multi_reduction <add>, %41, %cst_13 [1, 2] : vector<1x8x32xf32> to vector<1xf32>
    %43 = vector.shape_cast %42 : vector<1xf32> to vector<1x1x1xf32>
    %44 = vector.extract %43[0, 0, 0] : f32 from vector<1x1x1xf32>
    %cst_14 = arith.constant 5.000000e-01 : f32
    %45 = arith.mulf %cst_14, %44 : f32
    %46 = math.log %35 : vector<8x32xf32>
    %47 = vector.broadcast %8 : vector<8x1xf32> to vector<8x32xf32>
    %48 = arith.mulf %46, %47 : vector<8x32xf32>
    %49 = vector.shape_cast %48 : vector<8x32xf32> to vector<1x8x32xf32>
    %cst_15 = arith.constant dense<0.000000e+00> : vector<1xf32>
    %50 = vector.multi_reduction <add>, %49, %cst_15 [1, 2] : vector<1x8x32xf32> to vector<1xf32>
    %51 = vector.shape_cast %50 : vector<1xf32> to vector<1x1x1xf32>
    %52 = vector.extract %51[0, 0, 0] : f32 from vector<1x1x1xf32>
    %53 = arith.subf %45, %52 : f32
    %54 = tpu.iota {dimensions = array<i32: 2>} : vector<1x8x128xi32>
    %c0_i32 = arith.constant 0 : i32
    %55 = vector.broadcast %c0_i32 : i32 to vector<1x8x128xi32>
    %56 = arith.cmpi eq, %54, %55 : vector<1x8x128xi32>
    %c1_i32 = arith.constant 1 : i32
    %57 = vector.broadcast %c1_i32 : i32 to vector<1x8x128xi32>
    %58 = arith.cmpi eq, %54, %57 : vector<1x8x128xi32>
    %cst_16 = arith.constant 0.000000e+00 : f32
    %59 = vector.broadcast %53 : f32 to vector<1x8x128xf32>
    %60 = vector.broadcast %cst_16 : f32 to vector<1x8x128xf32>
    %61 = arith.select %58, %59, %60 : vector<1x8x128xi1>, vector<1x8x128xf32>
    %62 = vector.broadcast %33 : f32 to vector<1x8x128xf32>
    %63 = arith.select %56, %62, %61 : vector<1x8x128xi1>, vector<1x8x128xf32>
    %c0_17 = arith.constant 0 : index
    %c0_18 = arith.constant 0 : index
    %c0_19 = arith.constant 0 : index
    %64 = vector.load %arg5[%c0_17, %c0_18, %c0_19] : memref<1x8x128xf32, #tpu.memory_space<vmem>>, vector<1x8x128xf32>
    tpu.vector_store %arg5[%c0_17, %c0_18, %c0_19], %63 {strides = array<i32>} : memref<1x8x128xf32, #tpu.memory_space<vmem>>, vector<1x8x128xf32>,
    return
  }
  func.func @transform_0(%arg0: i32) -> (i32, i32) {
    %c0_i32 = arith.constant 0 : i32
    %c0_i32_0 = arith.constant 0 : i32
    return %arg0, %c0_i32 : i32, i32
  }
  func.func @transform_1(%arg0: i32) -> (i32, i32) {
    %c0_i32 = arith.constant 0 : i32
    %c0_i32_0 = arith.constant 0 : i32
    return %arg0, %c0_i32 : i32, i32
  }
  func.func @transform_2(%arg0: i32) -> (i32, i32) {
    %c0_i32 = arith.constant 0 : i32
    %c0_i32_0 = arith.constant 0 : i32
    return %arg0, %c0_i32 : i32, i32
  }
  func.func @transform_3(%arg0: i32) -> (i32, i32) {
    %c0_i32 = arith.constant 0 : i32
    %c0_i32_0 = arith.constant 0 : i32
    return %arg0, %c0_i32 : i32, i32
  }
  func.func @transform_4(%arg0: i32) -> (i32, i32, i32) {
    %c0_i32 = arith.constant 0 : i32
    %c0_i32_0 = arith.constant 0 : i32
    %c0_i32_1 = arith.constant 0 : i32
    return %arg0, %c0_i32, %c0_i32_0 : i32, i32, i32
  }
}

</mosaic_0001>

<bundles_post_ra>
// kernel: tpu_custom_call.1
= control target key start
LH: loop header
LB: loop body
LE: loop exit
PB: predicated region body
PF: predicated region fallthrough
CT: control target
= control target key end

     0   :  { %9 = vsyncpa [#allocation3], 0  ;;  %s300_s0 = inlined_call_operand.vmem [shape: s32[8,1], index: 0, kind: input, shape index: {}]   ;;  %s301_s1 = inlined_call_operand.vmem [shape: f32[8,32], index: 1, kind: input, shape index: {}]   ;;  %s302_s2 = inlined_call_operand.hbm [shape: f32[8,32], index: 2, kind: input, shape index: {}]   ;;  %s303_s3 = inlined_call_operand.hbm [shape: f32[8,32], index: 3, kind: input, shape index: {}]   ;;  %s304_s4 = inlined_call_operand.hbm [shape: f32[1,8,128], index: 4, kind: output, shape index: {}]  }
   0x1   :  { %10 = vsyncpa [#allocation6], 0 }
   0x2   :  { %11 = vsyncpa [#allocation4], 0  ;;  %s21_s17 = sshll.u32 %s302_s2, 4  ;;  %s245_s18 = smov [#allocation2]   ;;  %s22_s17 = int_to_ptr.hbm [resolvable:$true] %s21_s17 }
   0x3   :  { %s23_s19 = sshll.u32 %s245_s18, 4  ;;  %s32_s22 = sshll.u32 %s303_s3, 4  ;;  %s24_s19 = int_to_ptr.vmem [resolvable:$true] %s23_s19  ;;  %s33_s22 = int_to_ptr.hbm [resolvable:$true] %s32_s22 }
   0x4   :  { %26 = dma.hbm_to_vmem [thread:$0]  %s22_s17, 128, %s24_s19, [#allocation3]  }
   0x5   :  { %s246_s23 = smov [#allocation5]  }
   0x6   :  { %s34_s24 = sshll.u32 %s246_s23, 4  ;;  %s35_s24 = int_to_ptr.vmem [resolvable:$true] %s34_s24 }
   0x7   :  { %37 = dma.hbm_to_vmem [thread:$0]  %s33_s22, 128, %s35_s24, [#allocation6]  }
   0x8   :  { %239 = dma.done.wait [#allocation3], 128  }
   0x9   :  { %240 = vsyncadd [#allocation3], 4294967168 }
   0xa   :  { %241 = dma.done.wait [#allocation6], 128  }
   0xb   :  { %242 = vsyncadd [#allocation6], 4294967168  ;;  %v247_v0 = vmov 0   ;;  %vm55_vm0 = vcmask 261120   ;;  %v46_v1 = vld [vmem:[%s301_s1] sm:$0xff]  ;;  %v69_v9 = vlaneseq  ;;  %v94_v16 = vld [vmem:[#allocation5] sm:$0xff] }
   0xc   :  { %160 = vset.pattern.permute.xlu0 %v247_v0  ;;  %v56_v2 = vsel %vm55_vm0, %v46_v1, -inf  ;;  %v68_v3 = vld [vmem:[%s300_s0] sm:$0xff]  ;;  %v248_v12 = vmov 0.003125   ;;  %vm82_vm2 = vcmask 7168   ;;  %v96_v28 = vmul.f32 %v94_v16, %v94_v16  ;;  %s249_s29 = smov [#allocation7]  }
   0xd   :  { %57 = vmax.xlane.f32.xlu0 %v56_v2  ;;  %v289_v10 = vand.u32 127, %v69_v9  ;;  %v93_v24 = vld [vmem:[#allocation2] sm:$0xff]  ;;  %s136_s30 = sshll.u32 %s249_s29, 4  ;;  %s138_s8 = sshll.u32 %s304_s4, 4  ;;  %s137_s30 = int_to_ptr.vmem [resolvable:$true] %s136_s30  ;;  %s139_s8 = int_to_ptr.hbm [resolvable:$true] %s138_s8 }
   0xe   :  { %v95_v27 = vmul.f32 %v93_v24, %v93_v24 }
   0xf   :  { %vm125_vm3 = vcmp.eq.s32.totalorder %v289_v10, 1  ;;  %vm124_vm4 = vcmp.eq.s32.totalorder %v289_v10, 0 }
  0x10   :  { %v97_v30 = vadd.f32 %v96_v28, %v95_v27 }
  0x12   :  { %v99_v31 = vsel %vm55_vm0, %v97_v30, 0.0 }
  0x21   :  { %72 = vperm.xlu0 %160, %v68_v3  }
  0x80   :  { %v58_v4 = vpop.xlane.xlu0 %57 }
  0x81   :  { %v59_v5 = vsub.f32 %v46_v1, %v58_v4 }
  0x83   :  { %v60_v6 = vmul.f32 1.442695, %v59_v5 }
  0x85   :  { %161 = vpow2.f32 %v60_v6 }
  0x86   :  { %163 = vlog2.f32 %v94_v16 }
  0x8b   :  { %v162_v7 = vpop.eup %161 }
  0x8c   :  { %v62_v8 = vsel %vm55_vm0, %v162_v7, 0.0  ;;  %v164_v17 = vpop.eup %163 }
  0x8d   :  { %63 = vadd.xlane.f32.xlu1 %v62_v8  ;;  %v111_v18 = vmul.f32 0.6931472, %v164_v17 }
  0x8f   :  { %v113_v19 = vsel %vm55_vm0, %v111_v18, 0.0 }
  0x93   :  { %v73_v11 = vpop.permute.xlu0 %72 }
  0x94   :  { %vm74_vm1 = vcmp.eq.s32.totalorder %v289_v10, %v73_v11 }
  0x95   :  { %v75_v13 = vsel %vm74_vm1, 0.903125, %v248_v12 }
  0x96   :  { %v76_v14 = vmul.f32 %v75_v13, %v46_v1 }
  0x98   :  { %v77_v15 = vsel %vm55_vm0, %v76_v14, 0.0 }
  0x99   :  { %78 = vadd.xlane.f32.xlu1 %v77_v15 }
  0xa1   :  { %114 = vadd.xlane.f32.xlu1 %v113_v19 }
 0x100   :  { %v64_v20 = vpop.xlane.xlu1 %63 }
 0x101   :  { %165 = vlog2.f32 %v64_v20 }
 0x107   :  { %v166_v21 = vpop.eup %165 }
 0x108   :  { %v66_v22 = vmul.f32 0.6931472, %v166_v21 }
 0x10a   :  { %v67_v23 = vadd.f32 %v66_v22, %v58_v4 }
 0x10c   :  { %v79_v25 = vpop.xlane.xlu1 %78 }
 0x10d   :  { %v80_v26 = vsub.f32 %v67_v23, %v79_v25 }
 0x10f   :  { %v83_v29 = vsel %vm82_vm2, %v80_v26, 0.0 }
 0x110   :  { %84 = vadd.xlane.f32.xlu2 %v83_v29 }
 0x114   :  { %v115_v32 = vpop.xlane.xlu1 %114 }
 0x115   :  { %v116_v34 = vrot.slane %v115_v32, 4 }
 0x117   :  { %v117_v37 = vadd.f32 %v116_v34, %v115_v32 }
 0x118   :  { %100 = vadd.xlane.f32.xlu2 %v99_v31 }
 0x119   :  { %v118_v40 = vrot.slane %v117_v37, 2 }
 0x11b   :  { %v119_v46 = vadd.f32 %v118_v40, %v117_v37 }
 0x11d   :  { %v120_v49 = vrot.slane %v119_v46, 1 }
 0x11f   :  { %v121_v52 = vadd.f32 %v120_v49, %v119_v46 }
 0x183   :  { %v85_v33 = vpop.xlane.xlu2 %84 }
 0x184   :  { %v86_v35 = vrot.slane %v85_v33, 4 }
 0x186   :  { %v87_v36 = vadd.f32 %v86_v35, %v85_v33 }
 0x188   :  { %v88_v38 = vrot.slane %v87_v36, 2 }
 0x18a   :  { %v89_v39 = vadd.f32 %v88_v38, %v87_v36 }
 0x18b   :  { %v101_v41 = vpop.xlane.xlu2 %100 }
 0x18c   :  { %v102_v42 = vrot.slane %v101_v41, 4  ;;  %v90_v43 = vrot.slane %v89_v39, 1 }
 0x18e   :  { %v103_v44 = vadd.f32 %v102_v42, %v101_v41  ;;  %v91_v45 = vadd.f32 %v90_v43, %v89_v39 }
 0x190   :  { %v104_v47 = vrot.slane %v103_v44, 2  ;;  %149 = vpush %v91_v45 }
 0x192   :  { %v105_v48 = vadd.f32 %v104_v47, %v103_v44 }
 0x194   :  { %v106_v50 = vrot.slane %v105_v48, 1 }
 0x196   :  { %v107_v51 = vadd.f32 %v106_v50, %v105_v48 }
 0x198   :  { %151 = vpush %v107_v51 }
 0x199   :  { %153 = vpush %v121_v52 }
 0x1c1   :  { %s150_s0 = spop %149 }
 0x1c2   :  { %v128_v54 = vstv %s150_s0 }
 0x1c9   :  { %s152_s1 = spop %151 }
 0x1ca   :  { %s109_s27 = smul.f32 0.5, %s152_s1  ;;  %s154_s28 = spop %153 }
 0x1cc   :  { %s123_s5 = ssub.f32 %s109_s27, %s154_s28 }
 0x1ce   :  { %v126_v53 = vstv %s123_s5 }
 0x1cf   :  { %v127_v55 = vsel %vm125_vm3, %v126_v53, 0.0 }
 0x1d0   :  { %v129_v56 = vsel %vm124_vm4, %v128_v54, %v127_v55 }
 0x1d1   :  { %130 = vst [vmem:[#allocation7] sm:$0xff] %v129_v56 }
 0x1d2   :  { %141 = dma.vmem_to_hbm [thread:$0]  %s137_s30, 128, %s139_s8, [#allocation4]  }
 0x1d3   :  { %243 = dma.done.wait [#allocation4], 128  }
 0x1d4   :  { %244 = vsyncadd [#allocation4], 4294967168 }
 0x1d5   :  { %146 = vsyncpa [#allocation3], 1 }
 0x1d6   :  { %147 = vsyncpa [#allocation6], 1 }
 0x1d7   :  { %148 = vsyncpa [#allocation4], 1 }

</bundles_post_ra>
